<compile_context>
chip_gen: v6e
topology: v6e:2x2x1
jax: 0.10.0
libtpu: 0.0.40
codegen_flags: <defaults>
</compile_context>

<pallas_src>
import math

import jax
import jax.numpy as jnp
from jax.experimental import pallas as pl
from jax.experimental.pallas import tpu as pltpu

EPS = 0.0003
H1, H2, H3 = 256, 128, 64
LANE = 128
SUBLANE = 8


def _round_up(x, m):
    return ((x + m - 1) // m) * m


def _pad2d(x, rows, cols):
    r, c = x.shape
    return jnp.pad(x, ((0, rows - r), (0, cols - c)))


def _actor_kernel(alim_ref,
                  x_ref,
                  w1_ref, b1_ref,
                  w2_ref, b2_ref,
                  w3_ref, b3_ref,
                  w4_ref, b4_ref,
                  out_ref):
    """One batch tile of the 4-layer MLP. Weights are VMEM-resident across the
    grid; matmuls run bf16 on the MXU with f32 accumulation."""
    alim = alim_ref[0, 0]
    x = x_ref[...]                                              # (TB, K1p) bf16
    h1 = jnp.maximum(
        jnp.dot(x, w1_ref[...], preferred_element_type=jnp.float32)
        + b1_ref[...], 0.0).astype(jnp.bfloat16)
    h2 = jnp.maximum(
        jnp.dot(h1, w2_ref[...], preferred_element_type=jnp.float32)
        + b2_ref[...], 0.0).astype(jnp.bfloat16)
    h3 = jnp.maximum(
        jnp.dot(h2, w3_ref[...], preferred_element_type=jnp.float32)
        + b3_ref[...], 0.0).astype(jnp.bfloat16)
    a = jnp.tanh(
        jnp.dot(h3, w4_ref[...], preferred_element_type=jnp.float32)
        + b4_ref[...])
    out_ref[...] = (a * alim).astype(out_ref.dtype)


def actor_forward(state, params, action_lim, *, block_b=None):
    """state: (B, state_dim) f32; params: dict of (in,out) weights and (1,out)
    biases (f32, logical shapes). Returns (B, action_dim) f32 actions."""
    B, state_dim = state.shape
    action_dim = params["w4"].shape[1]

    kp = _round_up(state_dim, LANE)      # padded fc1 K dim
    h3p = _round_up(H3, LANE)            # 64  -> 128
    np_ = _round_up(action_dim, LANE)    # 4   -> 128 (lane-dense output block)

    if block_b is None:
        # Big enough to amortize per-step overhead (~0.35us/step), small
        # enough that double-buffered tiles + resident weights fit easily in
        # VMEM even on v7x (64 MiB physical).
        block_b = min(512, _round_up(B, SUBLANE))
    block_b = max(SUBLANE, block_b)
    bp = _round_up(B, block_b)

    # ---- zero-pad + cast: weights/state bf16, biases f32 -------------------
    x_p = _pad2d(state, bp, kp).astype(jnp.bfloat16)
    w1_p = _pad2d(params["w1"], kp, H1).astype(jnp.bfloat16)
    w2_p = params["w2"].astype(jnp.bfloat16)                    # (256, 128)
    w3_p = _pad2d(params["w3"], H2, h3p).astype(jnp.bfloat16)
    w4_p = _pad2d(params["w4"], h3p, np_).astype(jnp.bfloat16)
    b1_p = params["b1"]
    b2_p = params["b2"]
    b3_p = _pad2d(params["b3"], 1, h3p)
    b4_p = _pad2d(params["b4"], 1, np_)
    alim = jnp.asarray(action_lim, dtype=jnp.float32).reshape(1, 1)

    grid = (bp // block_b,)

    def _resident(i):        # weights/biases: same block every grid step
        return (0, 0)

    in_specs = [
        pl.BlockSpec(memory_space=pltpu.MemorySpace.SMEM),        # action_lim
        pl.BlockSpec((block_b, kp), lambda i: (i, 0)),            # state tile
        pl.BlockSpec((kp, H1), _resident),   pl.BlockSpec((1, H1), _resident),
        pl.BlockSpec((H1, H2), _resident),   pl.BlockSpec((1, H2), _resident),
        pl.BlockSpec((H2, h3p), _resident),  pl.BlockSpec((1, h3p), _resident),
        pl.BlockSpec((h3p, np_), _resident), pl.BlockSpec((1, np_), _resident),
    ]
    out_spec = pl.BlockSpec((block_b, np_), lambda i: (i, 0))

    out_padded = pl.pallas_call(
        _actor_kernel,
        grid=grid,
        in_specs=in_specs,
        out_specs=out_spec,
        out_shape=jax.ShapeDtypeStruct((bp, np_), jnp.float32),
        compiler_params=pltpu.CompilerParams(
            dimension_semantics=("parallel",),
            vmem_limit_bytes=32 * 1024 * 1024),
    )(alim, x_p, w1_p, b1_p, w2_p, b2_p, w3_p, b3_p, w4_p, b4_p)

    return out_padded[:B, :action_dim]


def init_actor_params(key, state_dim, action_dim):
    """Mirror the PyTorch module's init: xavier_normal_ for fc1-3 weights,
    uniform(-EPS, EPS) for fc4 weight, PyTorch-default uniform bias init.
    Weights stored transposed as (in, out); biases as (1, out)."""
    keys = jax.random.split(key, 8)

    def xavier_normal(k, fan_in, fan_out):
        std = math.sqrt(2.0 / (fan_in + fan_out))
        return std * jax.random.normal(k, (fan_in, fan_out), dtype=jnp.float32)

    def bias(k, fan_in, fan_out):
        bound = 1.0 / math.sqrt(fan_in)
        return jax.random.uniform(k, (1, fan_out), minval=-bound, maxval=bound,
                                  dtype=jnp.float32)

    return {
        "w1": xavier_normal(keys[0], state_dim, H1),
        "b1": bias(keys[1], state_dim, H1),
        "w2": xavier_normal(keys[2], H1, H2),
        "b2": bias(keys[3], H1, H2),
        "w3": xavier_normal(keys[4], H2, H3),
        "b3": bias(keys[5], H2, H3),
        "w4": jax.random.uniform(keys[6], (H3, action_dim),
                                 minval=-EPS, maxval=EPS, dtype=jnp.float32),
        "b4": bias(keys[7], H3, action_dim),
    }


if __name__ == "__main__":
    state_dim = 16
    action_dim = 4
    action_lim = 2.0
    batch = 8

    key = jax.random.PRNGKey(0)
    k_params, k_state = jax.random.split(key)
    params = init_actor_params(k_params, state_dim, action_dim)
    state = jax.random.normal(k_state, (batch, state_dim), dtype=jnp.float32)

    action = actor_forward(state, params, action_lim)
    action = jax.block_until_ready(action)

    # Pure-JAX f32 reference of the same forward pass (kernel runs bf16 inside).
    def ref(x):
        h = jnp.maximum(x @ params["w1"] + params["b1"], 0.0)
        h = jnp.maximum(h @ params["w2"] + params["b2"], 0.0)
        h = jnp.maximum(h @ params["w3"] + params["b3"], 0.0)
        return jnp.tanh(h @ params["w4"] + params["b4"]) * action_lim

    expect = ref(state)

    assert action.shape == (batch, action_dim)
    assert bool(jnp.all(jnp.abs(action) <= action_lim + 1e-5))
    assert bool(jnp.allclose(action, expect, atol=5e-2, rtol=5e-2))

    print("KERNEL_OK")
</pallas_src>

<mosaic_0001>
module attributes {stable_mosaic.version = 11 : i64} {
  func.func @_actor_kernel(%arg0: i32, %arg1: memref<1x1xf32, #tpu.memory_space<smem>>, %arg2: memref<8x128xbf16, #tpu.memory_space<vmem>>, %arg3: memref<128x256xbf16, #tpu.memory_space<vmem>>, %arg4: memref<1x256xf32, #tpu.memory_space<vmem>>, %arg5: memref<256x128xbf16, #tpu.memory_space<vmem>>, %arg6: memref<1x128xf32, #tpu.memory_space<vmem>>, %arg7: memref<128x128xbf16, #tpu.memory_space<vmem>>, %arg8: memref<1x128xf32, #tpu.memory_space<vmem>>, %arg9: memref<128x128xbf16, #tpu.memory_space<vmem>>, %arg10: memref<1x128xf32, #tpu.memory_space<vmem>>, %arg11: memref<8x128xf32, #tpu.memory_space<vmem>>) attributes {dimension_semantics = [#tpu.dimension_semantics<parallel>], iteration_bounds = array<i64: 1>, scalar_prefetch = 0 : i64, scratch_operands = 0 : i64, tpu.core_type = #tpu.core_type<tc>, window_params = [{transform_indices = @transform_0, window_bounds = array<i64: 1, 1>}, {transform_indices = @transform_1, window_bounds = array<i64: 8, 128>}, {pipeline_mode = #tpu.pipeline_mode<synchronous>, transform_indices = @transform_2, window_bounds = array<i64: 128, 256>}, {pipeline_mode = #tpu.pipeline_mode<synchronous>, transform_indices = @transform_3, window_bounds = array<i64: 1, 256>}, {pipeline_mode = #tpu.pipeline_mode<synchronous>, transform_indices = @transform_4, window_bounds = array<i64: 256, 128>}, {pipeline_mode = #tpu.pipeline_mode<synchronous>, transform_indices = @transform_5, window_bounds = array<i64: 1, 128>}, {pipeline_mode = #tpu.pipeline_mode<synchronous>, transform_indices = @transform_6, window_bounds = array<i64: 128, 128>}, {pipeline_mode = #tpu.pipeline_mode<synchronous>, transform_indices = @transform_7, window_bounds = array<i64: 1, 128>}, {pipeline_mode = #tpu.pipeline_mode<synchronous>, transform_indices = @transform_8, window_bounds = array<i64: 128, 128>}, {pipeline_mode = #tpu.pipeline_mode<synchronous>, transform_indices = @transform_9, window_bounds = array<i64: 1, 128>}, {transform_indices = @transform_10, window_bounds = array<i64: 8, 128>}]} {
    %c0 = arith.constant 0 : index
    %c0_0 = arith.constant 0 : index
    %0 = memref.load %arg1[%c0, %c0_0] : memref<1x1xf32, #tpu.memory_space<smem>>
    %c0_1 = arith.constant 0 : index
    %c0_2 = arith.constant 0 : index
    %1 = vector.load %arg2[%c0_1, %c0_2] : memref<8x128xbf16, #tpu.memory_space<vmem>>, vector<8x128xbf16>
    %c0_3 = arith.constant 0 : index
    %c0_4 = arith.constant 0 : index
    %2 = vector.load %arg3[%c0_3, %c0_4] : memref<128x256xbf16, #tpu.memory_space<vmem>>, vector<128x256xbf16>
    %cst = arith.constant dense<0.000000e+00> : vector<8x256xf32>
    %3 = tpu.matmul %1, %2, %cst {dimension_numbers = #tpu.dot_dimension_numbers<[1], [0], [0], [1], [0, 0, 1, 1], [], []>} : vector<8x128xbf16>, vector<128x256xbf16>, vector<8x256xf32> -> vector<8x256xf32>
    %c0_5 = arith.constant 0 : index
    %c0_6 = arith.constant 0 : index
    %4 = vector.load %arg4[%c0_5, %c0_6] : memref<1x256xf32, #tpu.memory_space<vmem>>, vector<1x256xf32>
    %5 = vector.broadcast %4 : vector<1x256xf32> to vector<8x256xf32>
    %6 = arith.addf %3, %5 : vector<8x256xf32>
    %cst_7 = arith.constant 0.000000e+00 : f32
    %7 = vector.broadcast %cst_7 : f32 to vector<8x256xf32>
    %8 = arith.maximumf %6, %7 : vector<8x256xf32>
    %9 = arith.truncf %8 : vector<8x256xf32> to vector<8x256xbf16>
    %c0_8 = arith.constant 0 : index
    %c0_9 = arith.constant 0 : index
    %10 = vector.load %arg5[%c0_8, %c0_9] : memref<256x128xbf16, #tpu.memory_space<vmem>>, vector<256x128xbf16>
    %cst_10 = arith.constant dense<0.000000e+00> : vector<8x128xf32>
    %11 = tpu.matmul %9, %10, %cst_10 {dimension_numbers = #tpu.dot_dimension_numbers<[1], [0], [0], [1], [0, 0, 1, 1], [], []>} : vector<8x256xbf16>, vector<256x128xbf16>, vector<8x128xf32> -> vector<8x128xf32>
    %c0_11 = arith.constant 0 : index
    %c0_12 = arith.constant 0 : index
    %12 = vector.load %arg6[%c0_11, %c0_12] : memref<1x128xf32, #tpu.memory_space<vmem>>, vector<1x128xf32>
    %13 = vector.broadcast %12 : vector<1x128xf32> to vector<8x128xf32>
    %14 = arith.addf %11, %13 : vector<8x128xf32>
    %cst_13 = arith.constant 0.000000e+00 : f32
    %15 = vector.broadcast %cst_13 : f32 to vector<8x128xf32>
    %16 = arith.maximumf %14, %15 : vector<8x128xf32>
    %17 = arith.truncf %16 : vector<8x128xf32> to vector<8x128xbf16>
    %c0_14 = arith.constant 0 : index
    %c0_15 = arith.constant 0 : index
    %18 = vector.load %arg7[%c0_14, %c0_15] : memref<128x128xbf16, #tpu.memory_space<vmem>>, vector<128x128xbf16>
    %cst_16 = arith.constant dense<0.000000e+00> : vector<8x128xf32>
    %19 = tpu.matmul %17, %18, %cst_16 {dimension_numbers = #tpu.dot_dimension_numbers<[1], [0], [0], [1], [0, 0, 1, 1], [], []>} : vector<8x128xbf16>, vector<128x128xbf16>, vector<8x128xf32> -> vector<8x128xf32>
    %c0_17 = arith.constant 0 : index
    %c0_18 = arith.constant 0 : index
    %20 = vector.load %arg8[%c0_17, %c0_18] : memref<1x128xf32, #tpu.memory_space<vmem>>, vector<1x128xf32>
    %21 = vector.broadcast %20 : vector<1x128xf32> to vector<8x128xf32>
    %22 = arith.addf %19, %21 : vector<8x128xf32>
    %cst_19 = arith.constant 0.000000e+00 : f32
    %23 = vector.broadcast %cst_19 : f32 to vector<8x128xf32>
    %24 = arith.maximumf %22, %23 : vector<8x128xf32>
    %25 = arith.truncf %24 : vector<8x128xf32> to vector<8x128xbf16>
    %c0_20 = arith.constant 0 : index
    %c0_21 = arith.constant 0 : index
    %26 = vector.load %arg9[%c0_20, %c0_21] : memref<128x128xbf16, #tpu.memory_space<vmem>>, vector<128x128xbf16>
    %cst_22 = arith.constant dense<0.000000e+00> : vector<8x128xf32>
    %27 = tpu.matmul %25, %26, %cst_22 {dimension_numbers = #tpu.dot_dimension_numbers<[1], [0], [0], [1], [0, 0, 1, 1], [], []>} : vector<8x128xbf16>, vector<128x128xbf16>, vector<8x128xf32> -> vector<8x128xf32>
    %c0_23 = arith.constant 0 : index
    %c0_24 = arith.constant 0 : index
    %28 = vector.load %arg10[%c0_23, %c0_24] : memref<1x128xf32, #tpu.memory_space<vmem>>, vector<1x128xf32>
    %29 = vector.broadcast %28 : vector<1x128xf32> to vector<8x128xf32>
    %30 = arith.addf %27, %29 : vector<8x128xf32>
    %31 = math.tanh %30 : vector<8x128xf32>
    %32 = vector.broadcast %0 : f32 to vector<8x128xf32>
    %33 = arith.mulf %31, %32 : vector<8x128xf32>
    %c0_25 = arith.constant 0 : index
    %c0_26 = arith.constant 0 : index
    %34 = vector.load %arg11[%c0_25, %c0_26] : memref<8x128xf32, #tpu.memory_space<vmem>>, vector<8x128xf32>
    tpu.vector_store %arg11[%c0_25, %c0_26], %33 {strides = array<i32>} : memref<8x128xf32, #tpu.memory_space<vmem>>, vector<8x128xf32>,
    return
  }
  func.func @transform_0(%arg0: i32) -> (i32, i32) {
    %c0_i32 = arith.constant 0 : i32
    %c0_i32_0 = arith.constant 0 : i32
    %c0_i32_1 = arith.constant 0 : i32
    return %c0_i32, %c0_i32_0 : i32, i32
  }
  func.func @transform_1(%arg0: i32) -> (i32, i32) {
    %c0_i32 = arith.constant 0 : i32
    %c0_i32_0 = arith.constant 0 : i32
    return %arg0, %c0_i32 : i32, i32
  }
  func.func @transform_2(%arg0: i32) -> (i32, i32) {
    %c0_i32 = arith.constant 0 : i32
    %c0_i32_0 = arith.constant 0 : i32
    %c0_i32_1 = arith.constant 0 : i32
    return %c0_i32, %c0_i32_0 : i32, i32
  }
  func.func @transform_3(%arg0: i32) -> (i32, i32) {
    %c0_i32 = arith.constant 0 : i32
    %c0_i32_0 = arith.constant 0 : i32
    %c0_i32_1 = arith.constant 0 : i32
    return %c0_i32, %c0_i32_0 : i32, i32
  }
  func.func @transform_4(%arg0: i32) -> (i32, i32) {
    %c0_i32 = arith.constant 0 : i32
    %c0_i32_0 = arith.constant 0 : i32
    %c0_i32_1 = arith.constant 0 : i32
    return %c0_i32, %c0_i32_0 : i32, i32
  }
  func.func @transform_5(%arg0: i32) -> (i32, i32) {
    %c0_i32 = arith.constant 0 : i32
    %c0_i32_0 = arith.constant 0 : i32
    %c0_i32_1 = arith.constant 0 : i32
    return %c0_i32, %c0_i32_0 : i32, i32
  }
  func.func @transform_6(%arg0: i32) -> (i32, i32) {
    %c0_i32 = arith.constant 0 : i32
    %c0_i32_0 = arith.constant 0 : i32
    %c0_i32_1 = arith.constant 0 : i32
    return %c0_i32, %c0_i32_0 : i32, i32
  }
  func.func @transform_7(%arg0: i32) -> (i32, i32) {
    %c0_i32 = arith.constant 0 : i32
    %c0_i32_0 = arith.constant 0 : i32
    %c0_i32_1 = arith.constant 0 : i32
    return %c0_i32, %c0_i32_0 : i32, i32
  }
  func.func @transform_8(%arg0: i32) -> (i32, i32) {
    %c0_i32 = arith.constant 0 : i32
    %c0_i32_0 = arith.constant 0 : i32
    %c0_i32_1 = arith.constant 0 : i32
    return %c0_i32, %c0_i32_0 : i32, i32
  }
  func.func @transform_9(%arg0: i32) -> (i32, i32) {
    %c0_i32 = arith.constant 0 : i32
    %c0_i32_0 = arith.constant 0 : i32
    %c0_i32_1 = arith.constant 0 : i32
    return %c0_i32, %c0_i32_0 : i32, i32
  }
  func.func @transform_10(%arg0: i32) -> (i32, i32) {
    %c0_i32 = arith.constant 0 : i32
    %c0_i32_0 = arith.constant 0 : i32
    return %arg0, %c0_i32 : i32, i32
  }
}

</mosaic_0001>

<bundles_post_ra>
// kernel: tpu_custom_call.1
= control target key start
LH: loop header
LB: loop body
LE: loop exit
PB: predicated region body
PF: predicated region fallthrough
CT: control target
= control target key end

     0   :  { %16 = vsyncpa [#allocation4], 0  ;;  %s1139_s0 = inlined_call_operand.<no memory space> [shape: f32[1,1], index: 0, kind: input, shape index: {}]   ;;  %s1140_s1 = inlined_call_operand.hbm [shape: bf16[8,128], index: 1, kind: input, shape index: {}]   ;;  %s1141_s2 = inlined_call_operand.hbm [shape: bf16[128,256], index: 2, kind: input, shape index: {}]   ;;  %s1142_s3 = inlined_call_operand.vmem [shape: f32[1,256], index: 3, kind: input, shape index: {}]   ;;  %s1143_s4 = inlined_call_operand.hbm [shape: bf16[256,128], index: 4, kind: input, shape index: {}]   ;;  %s1144_s5 = inlined_call_operand.vmem [shape: f32[1,128], index: 5, kind: input, shape index: {}]   ;;  %s1145_s6 = inlined_call_operand.hbm [shape: bf16[128,128], index: 6, kind: input, shape index: {}]   ;;  %s1146_s7 = inlined_call_operand.vmem [shape: f32[1,128], index: 7, kind: input, shape index: {}]   ;;  %s1147_s8 = inlined_call_operand.hbm [shape: bf16[128,128], index: 8, kind: input, shape index: {}]   ;;  %s1148_s9 = inlined_call_operand.vmem [shape: f32[1,128], index: 9, kind: input, shape index: {}]   ;;  %s1149_s10 = inlined_call_operand.hbm [shape: f32[8,128], index: 10, kind: output, shape index: {}]  }
   0x1   :  { %17 = vsyncpa [#allocation7], 0 }
   0x2   :  { %18 = vsyncpa [#allocation10], 0 }
   0x3   :  { %19 = vsyncpa [#allocation5], 0  ;;  %s1011_s13 = smov [#allocation6]  }
   0x4   :  { %s37_s14 = sshll.u32 %s1011_s13, 4  ;;  %s38_s14 = int_to_ptr.vmem [resolvable:$true] %s37_s14 }
   0x5   :  { %s891_s15 = scalar_lea.vmem %s38_s14, 2048  ;;  %p896_p1 = scmp.lt.s32.totalorder %s38_s14, %s38_s14 }
   0x6   :  { %p892_p0 = scmp.ne.s32.totalorder %s38_s14, %s891_s15  ;;  %p897_p2 = scmp.lt.s32.totalorder %s891_s15, %s891_s15 }
   0x8   :  { %p898_p3 = por %p897_p2, %p896_p1 }
   0xa   :  { %p899_p4 = pnand %p898_p3, %p892_p0 }
   0xc   :  { %902 = shalt.err (!%p899_p4)
}
   0xd   :  { %s1012_s16 = smov 128   ;;  %s1013_s17 = smov 8  }
   0xe   :  { %43 = dma.hbm_to_vmem [thread:$0]  %s1141_s2, 2048, %s38_s14, [#allocation7], %s1012_s16, %s1012_s16, %s1013_s17  }
   0xf   :  { %s1014_s20 = smov [#allocation9]   ;;  %s1015_s22 = smov [#allocation3]  }
  0x10   :  { %s65_s21 = sshll.u32 %s1014_s20, 4  ;;  %s28_s23 = sshll.u32 %s1015_s22, 4  ;;  %s66_s21 = int_to_ptr.vmem [resolvable:$true] %s65_s21  ;;  %s29_s23 = int_to_ptr.vmem [resolvable:$true] %s28_s23 }
  0x11   :  { %s911_s24 = scalar_lea.vmem %s66_s21, 1024  ;;  %p916_p6 = scmp.lt.s32.totalorder %s66_s21, %s66_s21 }
  0x12   :  { %p912_p5 = scmp.ne.s32.totalorder %s66_s21, %s911_s24  ;;  %p917_p7 = scmp.lt.s32.totalorder %s911_s24, %s911_s24 }
  0x14   :  { %p918_p8 = por %p917_p7, %p916_p6 }
  0x16   :  { %p919_p9 = pnand %p918_p8, %p912_p5 }
  0x18   :  { %922 = shalt.err (!%p919_p9)
}
  0x19   :  { %s1016_s25 = smov 64   ;;  %s1017_s26 = smov 4  }
  0x1a   :  { %71 = dma.hbm_to_vmem [thread:$0]  %s1145_s6, 1024, %s66_s21, [#allocation10], %s1016_s25, %s1016_s25, %s1017_s26  }
  0x1b   :  { %s931_s2 = scalar_lea.vmem %s29_s23, 64  ;;  %p936_p11 = scmp.lt.s32.totalorder %s29_s23, %s29_s23 }
  0x1c   :  { %p932_p10 = scmp.ne.s32.totalorder %s29_s23, %s931_s2  ;;  %p937_p12 = scmp.lt.s32.totalorder %s931_s2, %s931_s2 }
  0x1e   :  { %p938_p13 = por %p937_p12, %p936_p11 }
  0x20   :  { %p939_p0 = pnand %p938_p13, %p932_p10 }
  0x22   :  { %942 = shalt.err (!%p939_p0)
}
  0x23   :  { %31 = dma.hbm_to_vmem [thread:$0]  %s1140_s1, 64, %s29_s23, [#allocation4]  }
  0x24   :  { %s1018_s11 = smov [#allocation8]   ;;  %s1019_s13 = smov [#allocation11]  }
  0x25   :  { %s51_s12 = sshll.u32 %s1018_s11, 4  ;;  %s79_s14 = sshll.u32 %s1019_s13, 4  ;;  %s52_s12 = int_to_ptr.vmem [resolvable:$true] %s51_s12  ;;  %s80_s14 = int_to_ptr.vmem [resolvable:$true] %s79_s14 }
  0x26   :  { %s951_s15 = scalar_lea.vmem %s52_s12, 2048  ;;  %p956_p2 = scmp.lt.s32.totalorder %s52_s12, %s52_s12 }
  0x27   :  { %p952_p1 = scmp.ne.s32.totalorder %s52_s12, %s951_s15  ;;  %p957_p3 = scmp.lt.s32.totalorder %s951_s15, %s951_s15 }
  0x29   :  { %p958_p4 = por %p957_p3, %p956_p2 }
  0x2b   :  { %p959_p5 = pnand %p958_p4, %p952_p1 }
  0x2d   :  { %962 = shalt.err (!%p959_p5)
}
  0x2e   :  { %57 = dma.hbm_to_vmem [thread:$0]  %s1143_s4, 2048, %s52_s12, [#allocation7], %s1016_s25, %s1016_s25, %s1017_s26  }
  0x2f   :  { %s971_s1 = scalar_lea.vmem %s80_s14, 1024  ;;  %p976_p7 = scmp.lt.s32.totalorder %s80_s14, %s80_s14 }
  0x30   :  { %p972_p6 = scmp.ne.s32.totalorder %s80_s14, %s971_s1  ;;  %p977_p8 = scmp.lt.s32.totalorder %s971_s1, %s971_s1 }
  0x32   :  { %p978_p9 = por %p977_p8, %p976_p7 }
  0x34   :  { %p979_p10 = pnand %p978_p9, %p972_p6 }
  0x36   :  { %982 = shalt.err (!%p979_p10)
}
  0x37   :  { %85 = dma.hbm_to_vmem [thread:$0]  %s1147_s8, 1024, %s80_s14, [#allocation10], %s1016_s25, %s1016_s25, %s1017_s26  }
  0x38   :  { %1003 = dma.done.wait [#allocation4], 64  }
  0x39   :  { %1004 = vsyncadd [#allocation4], 4294967232 }
  0x3a   :  { %1005 = dma.done.wait [#allocation7], 4096  }
  0x3b   :  { %1006 = vsyncadd [#allocation7], 4294963200 }
  0x3c   :  { %1007 = dma.done.wait [#allocation10], 2048  }
  0x3d   :  { %1008 = vsyncadd [#allocation10], 4294965248  ;;  %v1020_v0 = vmov 0   ;;  %v825_v1 = vld [vmem:[#allocation6 + $0x74] ss:$8 sps:$4 sm:$0xff]   ;;  %v853_v15 = vld [vmem:[#allocation8 + $0x68] sm:$0xff]   ;;  %v124_v40 = vlaneseq }
  0x3e   :  { %246 = vmatprep.mubr.bf16.mxu0 %v1020_v0  ;;  %v827_v2 = vld [vmem:[#allocation6 + $0x70] ss:$8 sps:$4 sm:$0xff]   ;;  %214 = vmatprep.subr.bf16.mxu0 %v825_v1  ;;  %v828_v3 = vld [vmem:[#allocation6 + $0x64] ss:$8 sps:$4 sm:$0xff]   ;;  %v830_v4 = vld [vmem:[#allocation6 + $0x60] ss:$8 sps:$4 sm:$0xff]  }
  0x3f   :  { %215 = vmatpush1.bf16.msra.mxu0 %v827_v2  ;;  %v831_v5 = vld [vmem:[#allocation6 + $0x54] ss:$8 sps:$4 sm:$0xff]   ;;  %v833_v6 = vld [vmem:[#allocation6 + $0x50] ss:$8 sps:$4 sm:$0xff]   ;;  %v834_v7 = vld [vmem:[#allocation6 + $0x44] ss:$8 sps:$4 sm:$0xff]  }
  0x40   :  { %216 = vmatprep.subr.bf16.mxu0 %v828_v3  ;;  %v836_v8 = vld [vmem:[#allocation6 + $0x40] ss:$8 sps:$4 sm:$0xff]   ;;  %v837_v9 = vld [vmem:[#allocation6 + $0x34] ss:$8 sps:$4 sm:$0xff]   ;;  %v839_v12 = vld [vmem:[#allocation6 + $0x30] ss:$8 sps:$4 sm:$0xff]  }
  0x41   :  { %v849_v10 = vld [vmem:[#allocation8 + $0x78] sm:$0xff]   ;;  %v851_v13 = vld [vmem:[#allocation8 + $0x70] sm:$0xff]   ;;  %v840_v16 = vld [vmem:[#allocation6 + $0x24] ss:$8 sps:$4 sm:$0xff]   ;;  %v1021_v35 = vmov 0.0   ;;  %v125_v41 = vshrl.u32 %v124_v40, 7 }
  0x42   :  { %v850_v11 = vld [vmem:[#allocation8 + $0x38] sm:$0xff]   ;;  %732 = vmatprep.subr.bf16.mxu1 %v849_v10  ;;  %v852_v14 = vld [vmem:[#allocation8 + $0x30] sm:$0xff]   ;;  %v842_v17 = vld [vmem:[#allocation6 + $0x20] ss:$8 sps:$4 sm:$0xff]   ;;  %vm1022_vm0 = vmmov 0   ;;  %s1023_s24 = smov [#allocation12]  }
  0x43   :  { %217 = vmatpush1.bf16.msra.mxu0 %v830_v4  ;;  %733 = vmatpush3.bf16.msra.mxu1 %v850_v11  ;;  %v854_v18 = vld [vmem:[#allocation8 + $0x28] sm:$0xff]   ;;  %v855_v19 = vld [vmem:[#allocation8 + $0x60] sm:$0xff]   ;;  %v843_v20 = vld [vmem:[#allocation6 + $0x14] ss:$8 sps:$4 sm:$0xff]   ;;  %v126_v42 = vsub.s32 0, %v125_v41  ;;  %v130_v44 = vsub.s32 1, %v125_v41 }
  0x44   :  { %218 = vmatprep.subr.bf16.mxu0 %v831_v5  ;;  %734 = vmatprep.subr.bf16.mxu1 %v851_v13  ;;  %v845_v21 = vld [vmem:[#allocation6 + $0x10] ss:$8 sps:$4 sm:$0xff]   ;;  %v846_v22 = vld [vmem:[#allocation6 + $0x4] ss:$8 sps:$4 sm:$0xff]   ;;  %v848_v26 = vld [vmem:[#allocation6] ss:$8 sps:$4 sm:$0xff]  }
  0x45   :  { %v856_v23 = vld [vmem:[#allocation8 + $0x20] sm:$0xff]   ;;  %v857_v24 = vld [vmem:[#allocation8 + $0x58] sm:$0xff]   ;;  %v859_v27 = vld [vmem:[#allocation8 + $0x50] sm:$0xff]   ;;  %s670_s25 = sshll.u32 %s1023_s24, 4  ;;  %s671_s25 = int_to_ptr.vmem [resolvable:$true] %s670_s25 }
  0x46   :  { %v858_v25 = vld [vmem:[#allocation8 + $0x18] sm:$0xff]   ;;  %v860_v28 = vld [vmem:[#allocation8 + $0x10] sm:$0xff]   ;;  %v861_v30 = vld [vmem:[#allocation8 + $0x48] sm:$0xff]   ;;  %s983_s26 = scalar_lea.vmem %s671_s25, 128  ;;  %p988_p12 = scmp.lt.s32.totalorder %s671_s25, %s671_s25 }
  0x47   :  { %219 = vmatpush1.bf16.msra.mxu0 %v833_v6  ;;  %735 = vmatpush3.bf16.msra.mxu1 %v852_v14  ;;  %v105_v29 = vld [vmem:[#allocation3] sm:$0xf]  ;;  %v862_v31 = vld [vmem:[#allocation8 + $0x8] sm:$0xff]   ;;  %v863_v32 = vld [vmem:[#allocation8 + $0x40] sm:$0xff]   ;;  %p984_p11 = scmp.ne.s32.totalorder %s671_s25, %s983_s26  ;;  %p989_p13 = scmp.lt.s32.totalorder %s983_s26, %s983_s26 }
  0x48   :  { %220 = vmatprep.subr.bf16.mxu0 %v834_v7  ;;  %736 = vmatprep.subr.bf16.mxu1 %v853_v15  ;;  %v864_v33 = vld [vmem:[#allocation8] sm:$0xff]   ;;  %v865_v34 = vld [vmem:[#allocation9 + $0x38] sm:$0xff]   ;;  %v866_v36 = vld [vmem:[#allocation9 + $0x30] sm:$0xff]  }
  0x49   :  { %v867_v37 = vld [vmem:[#allocation9 + $0x28] sm:$0xff]   ;;  %v868_v38 = vld [vmem:[#allocation9 + $0x20] sm:$0xff]   ;;  %v869_v39 = vld [vmem:[#allocation9 + $0x18] sm:$0xff]   ;;  %p990_p0 = por %p989_p13, %p988_p12 }
  0x4a   :  { %v122_v43 = vld [vmem:[%s1142_s3] sm:$0x3]  ;;  %v870_v57 = vld [vmem:[#allocation9 + $0x10] sm:$0xff]   ;;  %v871_v58 = vld [vmem:[#allocation9 + $0x8] sm:$0xff]  }
  0x4b   :  { %221 = vmatpush1.bf16.msra.mxu0 %v836_v8  ;;  %737 = vmatpush3.bf16.msra.mxu1 %v854_v18  ;;  %v127_v45 = vrot.slane %v122_v43, %v126_v42  ;;  %v131_v46 = vrot.slane %v122_v43, %v130_v44  ;;  %v872_v59 = vld [vmem:[#allocation9] sm:$0xff]   ;;  %v873_v60 = vld [vmem:[#allocation11 + $0x38] sm:$0xff]   ;;  %v874_v61 = vld [vmem:[#allocation11 + $0x30] sm:$0xff]   ;;  %p991_p1 = pnand %p990_p0, %p984_p11 }
  0x4c   :  { %222 = vmatprep.subr.bf16.mxu0 %v837_v9  ;;  %738 = vmatprep.subr.bf16.mxu1 %v855_v19  ;;  %v875_v62 = vld [vmem:[#allocation11 + $0x28] sm:$0xff]   ;;  %v876_v63 = vld [vmem:[#allocation11 + $0x20] sm:$0xff]   ;;  %v877_v0 = vld [vmem:[#allocation11 + $0x18] sm:$0xff]  }
  0x4d   :  { %v878_v1 = vld [vmem:[#allocation11 + $0x10] sm:$0xff]   ;;  %v697_v3 = vld [vmem:[%s1144_s5] ss:$0 sm:$0xff]  ;;  %v879_v11 = vld [vmem:[#allocation11 + $0x8] sm:$0xff]  }
  0x4e   :  { %v714_v13 = vld [vmem:[%s1146_s7] ss:$0 sm:$0xff] }
  0x4f   :  { %223 = vmatpush1.bf16.msra.mxu0 %v839_v12  ;;  %739 = vmatpush3.bf16.msra.mxu1 %v856_v23  ;;  %v880_v12 = vld [vmem:[#allocation11] sm:$0xff]  }
  0x50   :  { %224 = vmatprep.subr.bf16.mxu0 %v840_v16  ;;  %740 = vmatprep.subr.bf16.mxu1 %v857_v24 }
  0x53   :  { %225 = vmatpush1.bf16.msra.mxu0 %v842_v17  ;;  %741 = vmatpush3.bf16.msra.mxu1 %v858_v25 }
  0x54   :  { %226 = vmatprep.subr.bf16.mxu0 %v843_v20  ;;  %742 = vmatprep.subr.bf16.mxu1 %v859_v27  ;;  %v661_v27 = vstv %s1139_s0 }
  0x57   :  { %227 = vmatpush1.bf16.msra.mxu0 %v845_v21  ;;  %743 = vmatpush3.bf16.msra.mxu1 %v860_v28  ;;  %v723_v21 = vld [vmem:[%s1148_s9] ss:$0 sm:$0xff] }
  0x58   :  { %228 = vmatprep.subr.bf16.mxu0 %v846_v22  ;;  %744 = vmatprep.subr.bf16.mxu1 %v861_v30 }
  0x5b   :  { %229 = vmatpush1.bf16.msra.mxu0 %v848_v26  ;;  %745 = vmatpush3.bf16.msra.mxu1 %v862_v31 }
  0x5c   :  { %746 = vmatprep.subr.bf16.mxu1 %v863_v32  ;;  %772 = vmatprep.subr.bf16.mxu0 %v1021_v35 }
  0x5e   :  { %247 = vmatmul.mubr.bf16.vlgmr.msra.gmra.mxu0 %v105_v29 }
  0x5f   :  { %747 = vmatpush3.bf16.msra.mxu1 %v864_v33  ;;  %773 = vmatpush3.bf16.msra.mxu0 %v865_v34 }
  0x60   :  { %792 = vmatprep.subr.bf16.mxu1 %v1021_v35  ;;  %774 = vmatprep.subr.bf16.mxu0 %v1021_v35 }
  0x61   :  { %788 = vmatprep.mubr.msk.bf16.mxu0 %vm1022_vm0, %v1021_v35 }
  0x63   :  { %775 = vmatpush3.bf16.msra.mxu0 %v866_v36 }
  0x64   :  { %776 = vmatprep.subr.bf16.mxu0 %v1021_v35 }
  0x67   :  { %777 = vmatpush3.bf16.msra.mxu0 %v867_v37 }
  0x68   :  { %778 = vmatprep.subr.bf16.mxu0 %v1021_v35 }
  0x6b   :  { %779 = vmatpush3.bf16.msra.mxu0 %v868_v38 }
  0x6c   :  { %780 = vmatprep.subr.bf16.mxu0 %v1021_v35 }
  0x6f   :  { %781 = vmatpush3.bf16.msra.mxu0 %v869_v39 }
  0x70   :  { %782 = vmatprep.subr.bf16.mxu0 %v1021_v35 }
  0x73   :  { %783 = vmatpush3.bf16.msra.mxu0 %v870_v57 }
  0x74   :  { %784 = vmatprep.subr.bf16.mxu0 %v1021_v35 }
  0x77   :  { %785 = vmatpush3.bf16.msra.mxu0 %v871_v58 }
  0x78   :  { %786 = vmatprep.subr.bf16.mxu0 %v1021_v35 }
  0x7b   :  { %787 = vmatpush3.bf16.msra.mxu0 %v872_v59 }
 0x11e   :  { %v248_v47 = vpop.f32.mrf.mxu0 }
 0x11f   :  { %v249_v48 = vadd.f32 %v248_v47, %v127_v45 }
 0x120   :  { %v250_v49 = vpop.f32.mrf.mxu0 }
 0x121   :  { %v251_v50 = vadd.f32 %v250_v49, %v131_v46  ;;  %v255_v51 = vmax.f32 %v249_v48, 0.0 }
 0x122   :  { %v252_v52 = vpop.f32.mrf.mxu0 }
 0x123   :  { %v256_v53 = vmax.f32 %v251_v50, 0.0  ;;  %v257_v56 = vpack.c.bf16 %v255_v51, %v255_v51 }
 0x124   :  { %v253_v54 = vpop.f32.mrf.mxu0 }
 0x125   :  { %v258_v55 = vpack.c.bf16 %v256_v53, %v256_v53 }
 0x127   :  { %426 = vmatprep.mubr.bf16.mxu1 %v258_v55 }
 0x128   :  { %427 = vmatmul.mubr.bf16.vlgmr.msra.gmra.mxu1 %v257_v56 }
 0x129   :  { %808 = vmatprep.mubr.msk.bf16.mxu1 %vm1022_vm0, %v1021_v35  ;;  %793 = vmatpush3.bf16.msra.mxu1 %v873_v60 }
 0x12a   :  { %794 = vmatprep.subr.bf16.mxu1 %v1021_v35 }
 0x12d   :  { %795 = vmatpush3.bf16.msra.mxu1 %v874_v61 }
 0x12e   :  { %796 = vmatprep.subr.bf16.mxu1 %v1021_v35 }
 0x131   :  { %797 = vmatpush3.bf16.msra.mxu1 %v875_v62 }
 0x132   :  { %798 = vmatprep.subr.bf16.mxu1 %v1021_v35 }
 0x135   :  { %799 = vmatpush3.bf16.msra.mxu1 %v876_v63 }
 0x136   :  { %800 = vmatprep.subr.bf16.mxu1 %v1021_v35 }
 0x139   :  { %801 = vmatpush3.bf16.msra.mxu1 %v877_v0 }
 0x13a   :  { %802 = vmatprep.subr.bf16.mxu1 %v1021_v35 }
 0x13d   :  { %803 = vmatpush3.bf16.msra.mxu1 %v878_v1 }
 0x13e   :  { %804 = vmatprep.subr.bf16.mxu1 %v1021_v35 }
 0x141   :  { %805 = vmatpush3.bf16.msra.mxu1 %v879_v11 }
 0x142   :  { %806 = vmatprep.subr.bf16.mxu1 %v1021_v35 }
 0x145   :  { %807 = vmatpush3.bf16.msra.mxu1 %v880_v12 }
 0x1e8   :  { %v748_v2 = vpop.f32.mrf.mxu1 }
 0x1ea   :  { %v749_v4 = vpop.f32.mrf.mxu1 }
 0x1eb   :  { %v750_v5 = vadd.f32 %v749_v4, %v748_v2 }
 0x1ec   :  { %v751_v6 = vpop.f32.mrf.mxu1 }
 0x1ed   :  { %v429_v7 = vadd.f32 %v750_v5, %v697_v3 }
 0x1ee   :  { %v752_v8 = vpop.f32.mrf.mxu1 }
 0x1ef   :  { %v434_v9 = vmax.f32 %v429_v7, 0.0 }
 0x1f1   :  { %v435_v10 = vpack.c.bf16 %v434_v9, %v434_v9 }
 0x1f3   :  { %789 = vmatmul.mubr.bf16.vlgmr.msra.gmra.mxu0 %v435_v10 }
 0x2b3   :  { %v541_v14 = vpop.f32.mrf.mxu0 }
 0x2b4   :  { %v542_v15 = vadd.f32 %v714_v13, %v541_v14 }
 0x2b5   :  { %v790_v16 = vpop.f32.mrf.mxu0 }
 0x2b6   :  { %v547_v17 = vmax.f32 %v542_v15, 0.0 }
 0x2b7   :  { %v544_v18 = vpop.f32.mrf.mxu0 }
 0x2b8   :  { %v548_v19 = vpack.c.bf16 %v547_v17, %v547_v17 }
 0x2b9   :  { %v791_v20 = vpop.f32.mrf.mxu0 }
 0x2ba   :  { %809 = vmatmul.mubr.bf16.vlgmr.msra.gmra.mxu1 %v548_v19 }
 0x37a   :  { %v654_v22 = vpop.f32.mrf.mxu1 }
 0x37b   :  { %v655_v23 = vadd.f32 %v723_v21, %v654_v22 }
 0x37c   :  { %v810_v24 = vpop.f32.mrf.mxu1 }
 0x37d   :  { %881 = vtanh.f32 %v655_v23 }
 0x37e   :  { %v657_v25 = vpop.f32.mrf.mxu1 }
 0x380   :  { %v811_v26 = vpop.f32.mrf.mxu1 }
 0x38a   :  { %v882_v28 = vpop.eup %881 }
 0x38b   :  { %v662_v29 = vmul.f32 %v882_v28, %v661_v27 }
 0x38d   :  { %663 = vst [vmem:[#allocation12] sm:$0xff] %v662_v29 }
 0x38e   :  { %994 = shalt.err (!%p991_p1)
}
 0x38f   :  { %673 = dma.vmem_to_hbm [thread:$0]  %s671_s25, 128, %s1149_s10, [#allocation5]  }
 0x390   :  { %1009 = dma.done.wait [#allocation5], 128  }
 0x391   :  { %1010 = vsyncadd [#allocation5], 4294967168 }
 0x392   :  { %677 = vsyncpa [#allocation4], 1 }
 0x393   :  { %678 = vsyncpa [#allocation7], 1 }
 0x394   :  { %679 = vsyncpa [#allocation10], 1 }
 0x395   :  { %680 = vsyncpa [#allocation5], 1 }

</bundles_post_ra>
